<compile_context>
chip_gen: v6e
topology: v6e:2x2x1
jax: 0.10.0
libtpu: 0.0.40
codegen_flags: <defaults>
</compile_context>

<pallas_src>
import functools

import jax
import jax.numpy as jnp
from jax.experimental import pallas as pl
from jax.experimental.pallas import tpu as pltpu

_LANE = 128      # vreg lane width (last dim)
_SUBLANE = 8     # f32 sublane count


def _round_up(n: int, m: int) -> int:
    return ((n + m - 1) // m) * m


def _mlp_kernel(*refs, num_layers: int):
    """refs = (x, w0, b0, ..., w_{L-1}, b_{L-1}, out).

    out = W_{L-1}^T(... relu(x @ W0 + b0) ...) + b_{L-1}
    Activations never leave vregs/VMEM.  Matmuls accumulate in f32 on the MXU;
    bias-add / ReLU are done in f32 regardless of the weight storage dtype.
    """
    x_ref = refs[0]
    out_ref = refs[-1]
    out_width = out_ref.shape[-1]        # native output_dim (un-padded HBM writeback)

    h = x_ref[...]
    for i in range(num_layers):
        w_ref = refs[1 + 2 * i]
        b_ref = refs[2 + 2 * i]
        y = jnp.dot(h.astype(w_ref.dtype), w_ref[...],
                    preferred_element_type=jnp.float32)
        y = y + b_ref[...]                        # bias stored in f32
        if i < num_layers - 1:
            y = jnp.maximum(y, 0.0)               # ReLU on hidden layers only
        h = y
    out_ref[...] = h[:, :out_width].astype(out_ref.dtype)


def init_mlp_params(key, input_dim, hidden_dims, output_dim, dtype=jnp.float32):
    """Deterministic init mirroring the layer shapes of the PyTorch SimpleMLP."""
    if isinstance(hidden_dims, int):
        hidden_dims = [hidden_dims]
    dims = [input_dim] + list(hidden_dims) + [output_dim]
    params = []
    for din, dout in zip(dims[:-1], dims[1:]):
        key, kw, kb = jax.random.split(key, 3)
        bound = 1.0 / float(din) ** 0.5            # PyTorch nn.Linear default U(-1/sqrt(din), 1/sqrt(din))
        w = jax.random.uniform(kw, (din, dout), dtype, -bound, bound)
        b = jax.random.uniform(kb, (dout,), dtype, -bound, bound)
        params.append((w, b))
    return params


def prepare_params(params, compute_dtype=jnp.float32):
    """Pad hidden/output widths to 128 lanes ONCE at setup; layer-0 input rows are NOT padded
    (x is consumed at its native feature width).  Zero padding is exact: padded lanes carry
    zero weights + zero bias, and ReLU(0) == 0, so valid lanes are bit-identical.
    Weights are stored in `compute_dtype` (f32 or bf16); biases stay f32.
    """
    prepared = []
    prev_out_p = None
    for li, (w, b) in enumerate(params):
        din, dout = w.shape
        din_p = din if li == 0 else prev_out_p      # match previous layer's padded width
        dout_p = _round_up(dout, _LANE)
        wp = jnp.zeros((din_p, dout_p), compute_dtype).at[:din, :dout].set(
            w.astype(compute_dtype))
        bp = jnp.zeros((1, dout_p), jnp.float32).at[0, :dout].set(
            b.astype(jnp.float32))
        prepared.append((wp, bp))
        prev_out_p = dout_p
    return prepared


def _vmem_estimate_bytes(rows, din, prepared_params, output_dim, x_itemsize):
    """Rough VMEM footprint of one kernel instance (weights single-buffered,
    x/out tiles double-buffered by the pipeline, ~2 live f32 activations)."""
    weight_bytes = sum(w.size * w.dtype.itemsize + b.size * b.dtype.itemsize
                       for w, b in prepared_params)
    widest = max(w.shape[1] for w, _ in prepared_params)
    x_tile = rows * din * x_itemsize
    out_tile = rows * output_dim * 4
    act = rows * widest * 4
    return weight_bytes + 2 * x_tile + 2 * out_tile + 2 * act


def simple_mlp_forward(x, prepared_params, output_dim, *, batch_tile=1024):
    """Fused MLP forward.  `prepared_params` come from prepare_params()."""
    B, din = x.shape
    n = len(prepared_params)
    compute_dtype = prepared_params[0][0].dtype
    if x.dtype != compute_dtype:
        x = x.astype(compute_dtype)          # bf16 path: halves the x HBM read

    # Keep the batch tile sublane-friendly for f32 (8) and bf16 (16) packing.
    batch_tile = _round_up(max(batch_tile, _SUBLANE), 2 * _SUBLANE)

    kernel = functools.partial(_mlp_kernel, num_layers=n)
    flat_params = [a for wb in prepared_params for a in wb]
    vmem = pl.BlockSpec(memory_space=pltpu.MemorySpace.VMEM)
    out_shape = jax.ShapeDtypeStruct((B, output_dim), jnp.float32)

    rows = B if B <= batch_tile else batch_tile
    est = _vmem_estimate_bytes(rows, din, prepared_params, output_dim, x.dtype.itemsize)
    # Only raise the scoped-VMEM limit when we'd exceed v5e's 16 MiB default;
    # cap at 32 MiB (safe on v5e/v6e and within v7x's 64 MiB physical budget).
    vmem_limit = None if est <= (12 << 20) else min(est + (4 << 20), 32 << 20)

    if B <= batch_tile:
        # Grid-less path: one fused call, zero per-step pipelining overhead,
        # everything (x, weights, activations, out) VMEM-resident.
        kwargs = {}
        if vmem_limit is not None:
            kwargs["compiler_params"] = pltpu.CompilerParams(
                vmem_limit_bytes=int(vmem_limit))
        out = pl.pallas_call(
            kernel,
            out_shape=out_shape,
            in_specs=[vmem] * (1 + 2 * n),
            out_specs=vmem,
            **kwargs,
        )(x, *flat_params)
    else:
        # Batch-tiled path: only the batch axis is gridded ("parallel" -> v7x
        # megacore sharding; B > batch_tile guarantees >= 2 steps).  Weights and
        # biases are whole-array VMEM residents: fetched once, single-buffered.
        cp_kwargs = dict(dimension_semantics=("parallel",))
        if vmem_limit is not None:
            cp_kwargs["vmem_limit_bytes"] = int(vmem_limit)
        in_specs = [pl.BlockSpec((batch_tile, din), lambda i: (i, 0))]
        in_specs += [vmem] * (2 * n)
        out = pl.pallas_call(
            kernel,
            out_shape=out_shape,
            grid=(pl.cdiv(B, batch_tile),),           # ragged tail handled by block clamping
            in_specs=in_specs,
            out_specs=pl.BlockSpec((batch_tile, output_dim), lambda i: (i, 0)),
            compiler_params=pltpu.CompilerParams(**cp_kwargs),
        )(x, *flat_params)

    return out


def simple_mlp_reference(x, params):
    h = x.astype(jnp.float32)
    n = len(params)
    for i, (w, b) in enumerate(params):
        h = jnp.dot(h, w.astype(jnp.float32), precision="highest") + b.astype(jnp.float32)
        if i < n - 1:
            h = jnp.maximum(h, 0.0)
    return h


if __name__ == "__main__":
    key = jax.random.PRNGKey(0)
    k_p, k_x, k_xl = jax.random.split(key, 3)

    input_dim, hidden_dims, output_dim = 32, [64, 32], 1
    params = init_mlp_params(k_p, input_dim, hidden_dims, output_dim)

    # ---- f32, small batch: grid-less fused call --------------------------------
    prepared_f32 = prepare_params(params, compute_dtype=jnp.float32)
    x_small = jax.random.normal(k_x, (8, input_dim), jnp.float32)
    out_small = jax.block_until_ready(
        simple_mlp_forward(x_small, prepared_f32, output_dim))
    ref_small = simple_mlp_reference(x_small, params)
    assert out_small.shape == (8, output_dim), out_small.shape
    assert jnp.allclose(out_small, ref_small, atol=2e-3, rtol=2e-3), "small-batch f32 mismatch"

    # ---- f32, large ragged batch: batch-tiled grid (3 steps, partial last tile) -
    x_large = jax.random.normal(k_xl, (2500, input_dim), jnp.float32)
    out_large = jax.block_until_ready(
        simple_mlp_forward(x_large, prepared_f32, output_dim, batch_tile=1024))
    ref_large = simple_mlp_reference(x_large, params)
    assert out_large.shape == (2500, output_dim), out_large.shape
    assert jnp.allclose(out_large, ref_large, atol=2e-3, rtol=2e-3), "large-batch f32 mismatch"

    # ---- bf16 compute path (v6e/v7x HBM-traffic halving), loose tolerance -------
    prepared_bf16 = prepare_params(params, compute_dtype=jnp.bfloat16)
    out_bf16 = jax.block_until_ready(
        simple_mlp_forward(x_large, prepared_bf16, output_dim, batch_tile=1024))
    assert out_bf16.shape == (2500, output_dim), out_bf16.shape
    assert jnp.allclose(out_bf16, ref_large, atol=2e-2, rtol=2e-2), "bf16 mismatch"

    print("KERNEL_OK")
</pallas_src>

<mosaic_0001>
module attributes {stable_mosaic.version = 11 : i64} {
  func.func @_mlp_kernel(%arg0: memref<8x32xf32, #tpu.memory_space<vmem>>, %arg1: memref<32x128xf32, #tpu.memory_space<vmem>>, %arg2: memref<1x128xf32, #tpu.memory_space<vmem>>, %arg3: memref<128x128xf32, #tpu.memory_space<vmem>>, %arg4: memref<1x128xf32, #tpu.memory_space<vmem>>, %arg5: memref<128x128xf32, #tpu.memory_space<vmem>>, %arg6: memref<1x128xf32, #tpu.memory_space<vmem>>, %arg7: memref<8x1xf32, #tpu.memory_space<vmem>>) attributes {dimension_semantics = [], scalar_prefetch = 0 : i64, scratch_operands = 0 : i64, tpu.core_type = #tpu.core_type<tc>} {
    %c0 = arith.constant 0 : index
    %c0_0 = arith.constant 0 : index
    %0 = vector.load %arg0[%c0, %c0_0] : memref<8x32xf32, #tpu.memory_space<vmem>>, vector<8x32xf32>
    %c0_1 = arith.constant 0 : index
    %c0_2 = arith.constant 0 : index
    %1 = vector.load %arg1[%c0_1, %c0_2] : memref<32x128xf32, #tpu.memory_space<vmem>>, vector<32x128xf32>
    %cst = arith.constant dense<0.000000e+00> : vector<8x128xf32>
    %2 = tpu.matmul %0, %1, %cst {dimension_numbers = #tpu.dot_dimension_numbers<[1], [0], [0], [1], [0, 0, 1, 1], [], []>} : vector<8x32xf32>, vector<32x128xf32>, vector<8x128xf32> -> vector<8x128xf32>
    %c0_3 = arith.constant 0 : index
    %c0_4 = arith.constant 0 : index
    %3 = vector.load %arg2[%c0_3, %c0_4] : memref<1x128xf32, #tpu.memory_space<vmem>>, vector<1x128xf32>
    %4 = vector.broadcast %3 : vector<1x128xf32> to vector<8x128xf32>
    %5 = arith.addf %2, %4 : vector<8x128xf32>
    %cst_5 = arith.constant 0.000000e+00 : f32
    %6 = vector.broadcast %cst_5 : f32 to vector<8x128xf32>
    %7 = arith.maximumf %5, %6 : vector<8x128xf32>
    %c0_6 = arith.constant 0 : index
    %c0_7 = arith.constant 0 : index
    %8 = vector.load %arg3[%c0_6, %c0_7] : memref<128x128xf32, #tpu.memory_space<vmem>>, vector<128x128xf32>
    %cst_8 = arith.constant dense<0.000000e+00> : vector<8x128xf32>
    %9 = tpu.matmul %7, %8, %cst_8 {dimension_numbers = #tpu.dot_dimension_numbers<[1], [0], [0], [1], [0, 0, 1, 1], [], []>} : vector<8x128xf32>, vector<128x128xf32>, vector<8x128xf32> -> vector<8x128xf32>
    %c0_9 = arith.constant 0 : index
    %c0_10 = arith.constant 0 : index
    %10 = vector.load %arg4[%c0_9, %c0_10] : memref<1x128xf32, #tpu.memory_space<vmem>>, vector<1x128xf32>
    %11 = vector.broadcast %10 : vector<1x128xf32> to vector<8x128xf32>
    %12 = arith.addf %9, %11 : vector<8x128xf32>
    %cst_11 = arith.constant 0.000000e+00 : f32
    %13 = vector.broadcast %cst_11 : f32 to vector<8x128xf32>
    %14 = arith.maximumf %12, %13 : vector<8x128xf32>
    %c0_12 = arith.constant 0 : index
    %c0_13 = arith.constant 0 : index
    %15 = vector.load %arg5[%c0_12, %c0_13] : memref<128x128xf32, #tpu.memory_space<vmem>>, vector<128x128xf32>
    %cst_14 = arith.constant dense<0.000000e+00> : vector<8x128xf32>
    %16 = tpu.matmul %14, %15, %cst_14 {dimension_numbers = #tpu.dot_dimension_numbers<[1], [0], [0], [1], [0, 0, 1, 1], [], []>} : vector<8x128xf32>, vector<128x128xf32>, vector<8x128xf32> -> vector<8x128xf32>
    %c0_15 = arith.constant 0 : index
    %c0_16 = arith.constant 0 : index
    %17 = vector.load %arg6[%c0_15, %c0_16] : memref<1x128xf32, #tpu.memory_space<vmem>>, vector<1x128xf32>
    %18 = vector.broadcast %17 : vector<1x128xf32> to vector<8x128xf32>
    %19 = arith.addf %16, %18 : vector<8x128xf32>
    %20 = vector.extract_strided_slice %19 {offsets = [0, 0], sizes = [8, 1], strides = [1, 1]} : vector<8x128xf32> to vector<8x1xf32>
    %c0_17 = arith.constant 0 : index
    %c0_18 = arith.constant 0 : index
    %21 = vector.load %arg7[%c0_17, %c0_18] : memref<8x1xf32, #tpu.memory_space<vmem>>, vector<8x1xf32>
    tpu.vector_store %arg7[%c0_17, %c0_18], %20 {strides = array<i32>} : memref<8x1xf32, #tpu.memory_space<vmem>>, vector<8x1xf32>,
    return
  }
}

</mosaic_0001>

<bundles_post_ra>
// kernel: tpu_custom_call.1
= control target key start
LH: loop header
LB: loop body
LE: loop exit
PB: predicated region body
PF: predicated region fallthrough
CT: control target
= control target key end

     0   :  { %12 = vsyncpa [#allocation3], 0  ;;  %s703_s0 = inlined_call_operand.hbm [shape: f32[8,32], index: 0, kind: input, shape index: {}]   ;;  %s704_s1 = inlined_call_operand.hbm [shape: f32[32,128], index: 1, kind: input, shape index: {}]   ;;  %s705_s2 = inlined_call_operand.vmem [shape: f32[1,128], index: 2, kind: input, shape index: {}]   ;;  %s706_s3 = inlined_call_operand.hbm [shape: f32[128,128], index: 3, kind: input, shape index: {}]   ;;  %s707_s4 = inlined_call_operand.vmem [shape: f32[1,128], index: 4, kind: input, shape index: {}]   ;;  %s708_s5 = inlined_call_operand.hbm [shape: f32[128,128], index: 5, kind: input, shape index: {}]   ;;  %s709_s6 = inlined_call_operand.vmem [shape: f32[1,128], index: 6, kind: input, shape index: {}]   ;;  %s710_s7 = inlined_call_operand.vmem [shape: f32[8,1], index: 7, kind: output, shape index: {}]  }
   0x1   :  { %13 = vsyncpa [#allocation5], 0 }
   0x2   :  { %14 = vsyncpa [#allocation8], 0  ;;  %s580_s24 = smov [#allocation4]  }
   0x3   :  { %s30_s25 = sshll.u32 %s580_s24, 4  ;;  %s31_s25 = int_to_ptr.vmem [resolvable:$true] %s30_s25 }
   0x4   :  { %s502_s26 = scalar_lea.vmem %s31_s25, 512  ;;  %p507_p1 = scmp.lt.s32.totalorder %s31_s25, %s31_s25 }
   0x5   :  { %p503_p0 = scmp.ne.s32.totalorder %s31_s25, %s502_s26  ;;  %p508_p2 = scmp.lt.s32.totalorder %s502_s26, %s502_s26 }
   0x7   :  { %p509_p3 = por %p508_p2, %p507_p1 }
   0x9   :  { %p510_p4 = pnand %p509_p3, %p503_p0 }
   0xb   :  { %513 = shalt.err (!%p510_p4)
}
   0xc   :  { %s581_s27 = smov 128   ;;  %s582_s28 = smov 8  }
   0xd   :  { %36 = dma.hbm_to_vmem [thread:$0]  %s704_s1, 512, %s31_s25, [#allocation5], %s581_s27, %s581_s27, %s582_s28  }
   0xe   :  { %s583_s8 = smov [#allocation2]   ;;  %s584_s10 = smov [#allocation6]  }
   0xf   :  { %s21_s9 = sshll.u32 %s583_s8, 4  ;;  %s44_s11 = sshll.u32 %s584_s10, 4  ;;  %s22_s9 = int_to_ptr.vmem [resolvable:$true] %s21_s9  ;;  %s45_s11 = int_to_ptr.vmem [resolvable:$true] %s44_s11 }
  0x10   :  { %s522_s12 = scalar_lea.vmem %s22_s9, 128  ;;  %p527_p6 = scmp.lt.s32.totalorder %s22_s9, %s22_s9 }
  0x11   :  { %p523_p5 = scmp.ne.s32.totalorder %s22_s9, %s522_s12  ;;  %p528_p7 = scmp.lt.s32.totalorder %s522_s12, %s522_s12 }
  0x13   :  { %p529_p8 = por %p528_p7, %p527_p6 }
  0x15   :  { %p530_p9 = pnand %p529_p8, %p523_p5 }
  0x17   :  { %533 = shalt.err (!%p530_p9)
}
  0x18   :  { %24 = dma.hbm_to_vmem [thread:$0]  %s703_s0, 128, %s22_s9, [#allocation3]  }
  0x19   :  { %s542_s15 = scalar_lea.vmem %s45_s11, 2048  ;;  %p547_p11 = scmp.lt.s32.totalorder %s45_s11, %s45_s11 }
  0x1a   :  { %p543_p10 = scmp.ne.s32.totalorder %s45_s11, %s542_s15  ;;  %p548_p12 = scmp.lt.s32.totalorder %s542_s15, %s542_s15 }
  0x1c   :  { %p549_p13 = por %p548_p12, %p547_p11 }
  0x1e   :  { %p550_p0 = pnand %p549_p13, %p543_p10 }
  0x20   :  { %553 = shalt.err (!%p550_p0)
}
  0x21   :  { %50 = dma.hbm_to_vmem [thread:$0]  %s706_s3, 2048, %s45_s11, [#allocation5], %s581_s27, %s581_s27, %s582_s28  }
  0x22   :  { %s585_s17 = smov [#allocation7]  }
  0x23   :  { %s58_s18 = sshll.u32 %s585_s17, 4  ;;  %s59_s18 = int_to_ptr.vmem [resolvable:$true] %s58_s18 }
  0x24   :  { %s562_s19 = scalar_lea.vmem %s59_s18, 2048  ;;  %p567_p2 = scmp.lt.s32.totalorder %s59_s18, %s59_s18 }
  0x25   :  { %p563_p1 = scmp.ne.s32.totalorder %s59_s18, %s562_s19  ;;  %p568_p3 = scmp.lt.s32.totalorder %s562_s19, %s562_s19 }
  0x27   :  { %p569_p4 = por %p568_p3, %p567_p2 }
  0x29   :  { %p570_p5 = pnand %p569_p4, %p563_p1 }
  0x2b   :  { %573 = shalt.err (!%p570_p5)
}
  0x2c   :  { %64 = dma.hbm_to_vmem [thread:$0]  %s708_s5, 2048, %s59_s18, [#allocation8], %s581_s27, %s581_s27, %s582_s28  }
  0x2d   :  { %574 = dma.done.wait [#allocation3], 128  }
  0x2e   :  { %575 = vsyncadd [#allocation3], 4294967168 }
  0x2f   :  { %576 = dma.done.wait [#allocation5], 2560  }
  0x30   :  { %577 = vsyncadd [#allocation5], 4294964736 }
  0x31   :  { %578 = dma.done.wait [#allocation8], 2048  }
  0x32   :  { %579 = vsyncadd [#allocation8], 4294965248  ;;  %v586_v0 = vmov 0.0   ;;  %vm587_vm0 = vmmov 0   ;;  %v83_v1 = vld [vmem:[#allocation4 + $0x18] sm:$0xff]  ;;  %v82_v2 = vld [vmem:[#allocation4 + $0x10] sm:$0xff] }
  0x33   :  { %405 = vmatprep.subr.mxu0 %v586_v0  ;;  %413 = vmatprep.mubr.msk.f32.mxu0 %vm587_vm0, %v586_v0  ;;  %v181_v3 = vld [vmem:[#allocation6 + $0x78] sm:$0xff]  ;;  %v81_v4 = vld [vmem:[#allocation4 + $0x8] sm:$0xff]  ;;  %v180_v5 = vld [vmem:[#allocation6 + $0x70] sm:$0xff]  ;;  %vm91_vm1 = vcmask 261120   ;;  %vm353_vm2 = vcmask 7168  }
  0x34   :  { %416 = vmatprep.subr.mxu1 %v586_v0  ;;  %448 = vmatprep.mubr.msk.f32.mxu1 %vm587_vm0, %v586_v0  ;;  %v179_v6 = vld [vmem:[#allocation6 + $0x68] sm:$0xff]  ;;  %v80_v7 = vld [vmem:[#allocation4] sm:$0xff]  ;;  %v79_v8 = vld [vmem:[#allocation2] sm:$0xff] }
  0x35   :  { %406 = vmatpush3.msra.mxu0 %v83_v1  ;;  %417 = vmatpush3.msra.mxu1 %v181_v3  ;;  %v178_v9 = vld [vmem:[#allocation6 + $0x60] sm:$0xff]  ;;  %v177_v10 = vld [vmem:[#allocation6 + $0x58] sm:$0xff]  ;;  %v176_v11 = vld [vmem:[#allocation6 + $0x50] sm:$0xff] }
  0x36   :  { %407 = vmatprep.subr.mxu0 %v586_v0  ;;  %418 = vmatprep.subr.mxu1 %v586_v0  ;;  %v175_v12 = vld [vmem:[#allocation6 + $0x48] sm:$0xff]  ;;  %v174_v13 = vld [vmem:[#allocation6 + $0x40] sm:$0xff]  ;;  %v173_v14 = vld [vmem:[#allocation6 + $0x38] sm:$0xff] }
  0x37   :  { %408 = vmatpush3.msra.mxu0 %v82_v2  ;;  %419 = vmatpush3.msra.mxu1 %v180_v5  ;;  %v172_v15 = vld [vmem:[#allocation6 + $0x30] sm:$0xff]  ;;  %v171_v16 = vld [vmem:[#allocation6 + $0x28] sm:$0xff]  ;;  %v170_v17 = vld [vmem:[#allocation6 + $0x20] sm:$0xff] }
  0x38   :  { %409 = vmatprep.subr.mxu0 %v586_v0  ;;  %420 = vmatprep.subr.mxu1 %v586_v0  ;;  %v169_v18 = vld [vmem:[#allocation6 + $0x18] sm:$0xff]  ;;  %v168_v19 = vld [vmem:[#allocation6 + $0x10] sm:$0xff]  ;;  %v167_v20 = vld [vmem:[#allocation6 + $0x8] sm:$0xff] }
  0x39   :  { %410 = vmatpush3.msra.mxu0 %v81_v4  ;;  %421 = vmatpush3.msra.mxu1 %v179_v6  ;;  %v166_v21 = vld [vmem:[#allocation6] sm:$0xff]  ;;  %v275_v22 = vld [vmem:[#allocation7 + $0x78] sm:$0xff]  ;;  %v274_v23 = vld [vmem:[#allocation7 + $0x70] sm:$0xff] }
  0x3a   :  { %411 = vmatprep.subr.mxu0 %v586_v0  ;;  %422 = vmatprep.subr.mxu1 %v586_v0  ;;  %v273_v24 = vld [vmem:[#allocation7 + $0x68] sm:$0xff]  ;;  %v272_v25 = vld [vmem:[#allocation7 + $0x60] sm:$0xff]  ;;  %v271_v26 = vld [vmem:[#allocation7 + $0x58] sm:$0xff] }
  0x3b   :  { %412 = vmatpush3.msra.mxu0 %v80_v7  ;;  %423 = vmatpush3.msra.mxu1 %v178_v9  ;;  %v270_v27 = vld [vmem:[#allocation7 + $0x50] sm:$0xff]  ;;  %v269_v28 = vld [vmem:[#allocation7 + $0x48] sm:$0xff]  ;;  %v268_v29 = vld [vmem:[#allocation7 + $0x40] sm:$0xff] }
  0x3c   :  { %414 = vmatmul.mubr.msk.f32.vlgmr.msra.gmra.mxu0 %vm91_vm1, %v79_v8  ;;  %424 = vmatprep.subr.mxu1 %v586_v0  ;;  %v267_v30 = vld [vmem:[#allocation7 + $0x38] sm:$0xff]  ;;  %v266_v31 = vld [vmem:[#allocation7 + $0x30] sm:$0xff]  ;;  %v265_v32 = vld [vmem:[#allocation7 + $0x28] sm:$0xff] }
  0x3d   :  { %451 = vmatprep.subr.mxu0 %v586_v0  ;;  %425 = vmatpush3.msra.mxu1 %v177_v10  ;;  %v264_v33 = vld [vmem:[#allocation7 + $0x20] sm:$0xff]  ;;  %v263_v34 = vld [vmem:[#allocation7 + $0x18] sm:$0xff]  ;;  %v262_v40 = vld [vmem:[#allocation7 + $0x10] sm:$0xff] }
  0x3e   :  { %483 = vmatprep.mubr.msk.f32.mxu0 %vm587_vm0, %v586_v0  ;;  %426 = vmatprep.subr.mxu1 %v586_v0  ;;  %v362_v35 = vld [vmem:[%s705_s2] ss:$0 sm:$0xff]  ;;  %v261_v41 = vld [vmem:[#allocation7 + $0x8] sm:$0xff]  ;;  %v260_v42 = vld [vmem:[#allocation7] sm:$0xff] }
  0x3f   :  { %427 = vmatpush3.msra.mxu1 %v176_v11  ;;  %452 = vmatpush3.msra.mxu0 %v275_v22  ;;  %v364_v43 = vld [vmem:[%s707_s4] ss:$0 sm:$0xff] }
  0x40   :  { %428 = vmatprep.subr.mxu1 %v586_v0  ;;  %453 = vmatprep.subr.mxu0 %v586_v0  ;;  %v365_v48 = vld [vmem:[%s709_s6] ss:$0 sm:$0xff] }
  0x41   :  { %429 = vmatpush3.msra.mxu1 %v175_v12  ;;  %454 = vmatpush3.msra.mxu0 %v274_v23 }
  0x42   :  { %430 = vmatprep.subr.mxu1 %v586_v0  ;;  %455 = vmatprep.subr.mxu0 %v586_v0 }
  0x43   :  { %431 = vmatpush3.msra.mxu1 %v174_v13  ;;  %456 = vmatpush3.msra.mxu0 %v273_v24 }
  0x44   :  { %432 = vmatprep.subr.mxu1 %v586_v0  ;;  %457 = vmatprep.subr.mxu0 %v586_v0 }
  0x45   :  { %433 = vmatpush3.msra.mxu1 %v173_v14  ;;  %458 = vmatpush3.msra.mxu0 %v272_v25 }
  0x46   :  { %434 = vmatprep.subr.mxu1 %v586_v0  ;;  %459 = vmatprep.subr.mxu0 %v586_v0 }
  0x47   :  { %435 = vmatpush3.msra.mxu1 %v172_v15  ;;  %460 = vmatpush3.msra.mxu0 %v271_v26 }
  0x48   :  { %436 = vmatprep.subr.mxu1 %v586_v0  ;;  %461 = vmatprep.subr.mxu0 %v586_v0 }
  0x49   :  { %437 = vmatpush3.msra.mxu1 %v171_v16  ;;  %462 = vmatpush3.msra.mxu0 %v270_v27 }
  0x4a   :  { %438 = vmatprep.subr.mxu1 %v586_v0  ;;  %463 = vmatprep.subr.mxu0 %v586_v0 }
  0x4b   :  { %439 = vmatpush3.msra.mxu1 %v170_v17  ;;  %464 = vmatpush3.msra.mxu0 %v269_v28 }
  0x4c   :  { %440 = vmatprep.subr.mxu1 %v586_v0  ;;  %465 = vmatprep.subr.mxu0 %v586_v0 }
  0x4d   :  { %441 = vmatpush3.msra.mxu1 %v169_v18  ;;  %466 = vmatpush3.msra.mxu0 %v268_v29 }
  0x4e   :  { %442 = vmatprep.subr.mxu1 %v586_v0  ;;  %467 = vmatprep.subr.mxu0 %v586_v0 }
  0x4f   :  { %443 = vmatpush3.msra.mxu1 %v168_v19  ;;  %468 = vmatpush3.msra.mxu0 %v267_v30 }
  0x50   :  { %444 = vmatprep.subr.mxu1 %v586_v0  ;;  %469 = vmatprep.subr.mxu0 %v586_v0 }
  0x51   :  { %445 = vmatpush3.msra.mxu1 %v167_v20  ;;  %470 = vmatpush3.msra.mxu0 %v266_v31 }
  0x52   :  { %446 = vmatprep.subr.mxu1 %v586_v0  ;;  %471 = vmatprep.subr.mxu0 %v586_v0 }
  0x53   :  { %447 = vmatpush3.msra.mxu1 %v166_v21  ;;  %472 = vmatpush3.msra.mxu0 %v265_v32 }
  0x54   :  { %473 = vmatprep.subr.mxu0 %v586_v0 }
  0x55   :  { %474 = vmatpush3.msra.mxu0 %v264_v33 }
  0x56   :  { %475 = vmatprep.subr.mxu0 %v586_v0 }
  0x57   :  { %476 = vmatpush3.msra.mxu0 %v263_v34 }
  0x58   :  { %477 = vmatprep.subr.mxu0 %v586_v0 }
  0x59   :  { %478 = vmatpush3.msra.mxu0 %v262_v40 }
  0x5a   :  { %479 = vmatprep.subr.mxu0 %v586_v0 }
  0x5b   :  { %480 = vmatpush3.msra.mxu0 %v261_v41 }
  0x5c   :  { %481 = vmatprep.subr.mxu0 %v586_v0 }
  0x5d   :  { %482 = vmatpush3.msra.mxu0 %v260_v42 }
  0xfc   :  { %v161_v36 = vpop.f32.mrf.mxu0 }
  0xfd   :  { %v162_v37 = vadd.f32 %v362_v35, %v161_v36 }
  0xfe   :  { %v415_v38 = vpop.f32.mrf.mxu0 }
  0xff   :  { %v165_v39 = vmax.f32 %v162_v37, 0.0 }
 0x101   :  { %449 = vmatmul.mubr.f32.vlgmr.msra.gmra.mxu1 %v165_v39 }
 0x1c1   :  { %v255_v44 = vpop.f32.mrf.mxu1 }
 0x1c2   :  { %v256_v45 = vadd.f32 %v364_v43, %v255_v44 }
 0x1c3   :  { %v450_v46 = vpop.f32.mrf.mxu1 }
 0x1c4   :  { %v259_v47 = vmax.f32 %v256_v45, 0.0 }
 0x1c6   :  { %484 = vmatmul.mubr.f32.vlgmr.msra.gmra.mxu0 %v259_v47 }
 0x286   :  { %v349_v49 = vpop.f32.mrf.mxu0 }
 0x287   :  { %v350_v50 = vadd.f32 %v365_v48, %v349_v49 }
 0x288   :  { %v485_v51 = vpop.f32.mrf.mxu0 }
 0x289   :  { %354 = vst.msk [vmem:[%s710_s7] sm:$0xff] %vm353_vm2, %v350_v50 }
 0x28a   :  { %359 = vsyncpa [#allocation3], 1 }
 0x28b   :  { %360 = vsyncpa [#allocation5], 1 }
 0x28c   :  { %361 = vsyncpa [#allocation8], 1 }

</bundles_post_ra>
